<compile_context>
chip_gen: v7x
topology: tpu7x:2x2x1
jax: 0.10.0
libtpu: 0.0.40
codegen_flags: <defaults>
</compile_context>

<pallas_src>
import functools

import jax
import jax.numpy as jnp
from jax.experimental import pallas as pl
from jax.experimental.pallas import tpu as pltpu


def _round_up(a, b):
    return ((a + b - 1) // b) * b


# ----------------------------- fused Pallas kernel ---------------------------


def _fused_bottleneck_kernel(*refs, apply_expand, TH, Wa, Wc_pad):
    if apply_expand:
        (x_ref, w1_ref, b1_ref, wdw_ref, b2_ref, wpw_ref, b3_ref,
         o_ref, act_ref) = refs
    else:
        (x_ref, wdw_ref, b2_ref, wpw_ref, b3_ref, o_ref) = refs

    mid = wdw_ref.shape[1]
    rows = 4 * (TH + 1)                 # 4 polyphase planes x (TH+1) band rows

    # ---- stage 1: 1x1 expansion + folded BN1 + ReLU6 (one MXU matmul per band) ----
    if apply_expand:
        cin = x_ref.shape[-1]
        x2d = x_ref[0].reshape(rows * Wc_pad, cin)                  # bf16
        y1 = jnp.dot(x2d, w1_ref[...], preferred_element_type=jnp.float32)
        y1 = jnp.clip(y1 + b1_ref[...], 0.0, 6.0)
        act_ref[...] = y1.reshape(rows, Wc_pad, mid)                # f32 scratch

        def tap(p, r0, c0):                                         # (TH, Wa, mid) f32
            return act_ref[pl.ds(p * (TH + 1) + r0, TH), pl.ds(c0, Wa), :]
    else:
        # expansion == 1: depthwise reads the polyphase input planes directly.
        def tap(p, r0, c0):
            return x_ref[0, pl.ds(p * (TH + 1) + r0, TH),
                         pl.ds(c0, Wa), :].astype(jnp.float32)

    # ---- stage 2: 3x3 depthwise stride-2 + folded BN2 + ReLU6 (whole band at once) ----
    wdw = wdw_ref[...]                                              # (9, mid), BN2 folded
    acc = jnp.zeros((TH, Wa, mid), jnp.float32)
    for kh in range(3):
        rpar, r0 = kh % 2, kh // 2      # row parity / row offset inside the parity plane
        for kw in range(3):
            cpar, c0 = kw % 2, kw // 2
            p = 2 * rpar + cpar         # plane order: ee, eo, oe, oo
            acc = acc + tap(p, r0, c0) * wdw[3 * kh + kw:3 * kh + kw + 1, :]
    acc = jnp.clip(acc + b2_ref[...], 0.0, 6.0)

    # ---- stage 3: 1x1 projection + folded BN3 -- single band matmul, single store ----
    y = jnp.dot(acc.reshape(TH * Wa, mid).astype(jnp.bfloat16), wpw_ref[...],
                preferred_element_type=jnp.float32)
    o_ref[0] = (y + b3_ref[...]).astype(o_ref.dtype)


# ------------------------------- wrapper --------------------------------------


def bn_fold(gamma, beta, mean, var, eps=1e-5):
    scale = gamma / jnp.sqrt(var + eps)
    return scale, beta - mean * scale


def bottleneck_stride_two(x_nchw, params, expansion, *, vmem_budget=20 * 2**20):
    """Forward pass of BottleNeck_strideTwo. Input/Output NCHW (PyTorch convention)."""
    x = jnp.transpose(x_nchw, (0, 2, 3, 1))                # NCHW -> NHWC (channels on lanes)
    N, H, W, Cin = x.shape
    assert H % 2 == 0 and W % 2 == 0, "even spatial sizes only"
    Ho, Wo = H // 2, W // 2
    mid = expansion * Cin
    Cout = params["w_pw"].shape[1]
    apply_expand = expansion != 1

    Wa = _round_up(Wo, 8)        # accumulation / output column width (sublane aligned)
    Wc_pad = Wa + 8              # columns per polyphase plane (>= Wa+1, multiple of 8)
    Wp = 2 * Wc_pad              # padded input width

    # ---- fold eval-mode BatchNorm into the conv weights / biases ----
    s2, b2 = bn_fold(*params["bn2"])
    s3, b3 = bn_fold(*params["bn3"])
    wdw = (params["w_dw"] * s2[None, :]).astype(jnp.float32)        # (9, mid)
    wpw = (params["w_pw"] * s3[None, :]).astype(jnp.bfloat16)       # (mid, Cout)
    if apply_expand:
        s1, b1 = bn_fold(*params["bn1"])
        w1 = (params["w1"] * s1[None, :]).astype(jnp.bfloat16)      # (Cin, mid)

    # ---- 2x2 polyphase split of the zero-padded bf16 input ----
    xb = x.astype(jnp.bfloat16)
    xp = jnp.pad(xb, ((0, 0), (1, 1), (1, Wp - W - 1), (0, 0)))     # (N, H+2, Wp, Cin)
    x_er, x_or = xp[:, 0::2], xp[:, 1::2]                           # (N, Ho+1, Wp, Cin)
    planes = jnp.stack([x_er[:, :, 0::2], x_er[:, :, 1::2],
                        x_or[:, :, 0::2], x_or[:, :, 1::2]],
                       axis=1)                                      # (N, 4, Ho+1, Wc_pad, Cin)

    # ---- pick the largest row-band TH (divisor of Ho) fitting the VMEM budget ----
    def vmem_est(th):
        lane = 128
        cin_l, mid_l, cout_l = (_round_up(c, lane) for c in (Cin, mid, Cout))
        x_blk = 2 * 4 * (th + 1) * Wc_pad * cin_l * 2               # double-buffered bf16
        o_blk = 2 * th * Wa * cout_l * 4
        scr = 4 * (th + 1) * Wc_pad * mid_l * 4 if apply_expand else 0
        wts = 2 * (cin_l * mid_l + mid_l * cout_l) * 2 + 11 * mid_l * 4 + cout_l * 4
        return x_blk + o_blk + scr + wts

    divisors = [t for t in range(Ho, 0, -1) if Ho % t == 0]
    TH = next((t for t in divisors if vmem_est(t) <= vmem_budget), divisors[-1])
    NB = Ho // TH

    # Band-row gather: each band carries its own 1-row halo (even-row planes use row TH).
    row_idx = jnp.arange(NB)[:, None] * TH + jnp.arange(TH + 1)[None, :]     # (NB, TH+1)
    x_bands = planes[:, :, row_idx]                       # (N, 4, NB, TH+1, Wc_pad, Cin)
    x_main = jnp.transpose(x_bands, (0, 2, 1, 3, 4, 5)).reshape(
        N, NB * 4 * (TH + 1), Wc_pad, Cin)

    # ---- specs / operands ----
    def _full(a):
        return pl.BlockSpec(a.shape, lambda n, r, _nd=a.ndim: (0,) * _nd)

    x_spec = pl.BlockSpec((1, 4 * (TH + 1), Wc_pad, Cin), lambda n, r: (n, r, 0, 0))

    operands = [x_main]
    in_specs = [x_spec]
    if apply_expand:
        b1_row = b1.reshape(1, mid).astype(jnp.float32)
        operands += [w1, b1_row]
        in_specs += [_full(w1), _full(b1_row)]
    b2_row = b2.reshape(1, mid).astype(jnp.float32)
    b3_row = b3.reshape(1, Cout).astype(jnp.float32)
    operands += [wdw, b2_row, wpw, b3_row]
    in_specs += [_full(wdw), _full(b2_row), _full(wpw), _full(b3_row)]

    scratch = ([pltpu.VMEM((4 * (TH + 1), Wc_pad, mid), jnp.float32)]
               if apply_expand else [])

    steps = N * NB
    expand_flops = 2 * steps * 4 * (TH + 1) * Wc_pad * Cin * mid if apply_expand else 0
    flops = int(expand_flops + 18 * N * Ho * Wa * mid + 2 * N * Ho * Wa * mid * Cout)
    bytes_acc = int(x_main.size * x_main.dtype.itemsize
                    + N * Ho * Wa * Cout * 4
                    + sum(a.size * a.dtype.itemsize for a in operands[1:]))

    est = vmem_est(TH)
    vmem_limit = int(min(56 * 2**20, max(32 * 2**20, 2 * est + (4 << 20))))

    out = pl.pallas_call(
        functools.partial(_fused_bottleneck_kernel, apply_expand=apply_expand,
                          TH=TH, Wa=Wa, Wc_pad=Wc_pad),
        out_shape=jax.ShapeDtypeStruct((N, Ho * Wa, Cout), jnp.float32),
        grid=(N, NB),
        in_specs=in_specs,
        out_specs=pl.BlockSpec((1, TH * Wa, Cout), lambda n, r: (n, r, 0)),
        scratch_shapes=scratch,
        compiler_params=pltpu.CompilerParams(
            dimension_semantics=("parallel", "parallel"),
            vmem_limit_bytes=vmem_limit),
        cost_estimate=pl.CostEstimate(flops=flops, transcendentals=0,
                                      bytes_accessed=bytes_acc),
    )(*operands)

    out = out.reshape(N, Ho, Wa, Cout)[:, :, :Wo, :]       # strip column padding
    return jnp.transpose(out, (0, 3, 1, 2))                # NHWC -> NCHW


# ------------------------- params / reference / main -------------------------


def init_params(key, in_fts, out_fts, expansion):
    mid = expansion * in_fts
    ks = jax.random.split(key, 15)

    def bn(kg, kb, km, kv, c):
        return (
            1.0 + 0.1 * jax.random.normal(kg, (c,), jnp.float32),   # gamma
            0.1 * jax.random.normal(kb, (c,), jnp.float32),         # beta
            0.1 * jax.random.normal(km, (c,), jnp.float32),         # running_mean
            jax.random.uniform(kv, (c,), jnp.float32, 0.5, 1.5),    # running_var
        )

    return {
        # conv1: PyTorch weight (mid, in, 1, 1) stored as (in, mid) for x @ w
        "w1": 0.2 * jax.random.normal(ks[0], (in_fts, mid), jnp.float32),
        "bn1": bn(ks[1], ks[2], ks[3], ks[4], mid),
        # dw: PyTorch weight (mid, 1, 3, 3) stored as (9, mid) with row = kh*3+kw
        "w_dw": 0.2 * jax.random.normal(ks[5], (9, mid), jnp.float32),
        "bn2": bn(ks[6], ks[7], ks[8], ks[9], mid),
        # pw: PyTorch weight (out, mid, 1, 1) stored as (mid, out)
        "w_pw": 0.2 * jax.random.normal(ks[10], (mid, out_fts), jnp.float32),
        "bn3": bn(ks[11], ks[12], ks[13], ks[14], out_fts),
    }


def reference(x, params, expansion, eps=1e-5):
    """Pure-JAX NCHW reference matching the PyTorch module (eval-mode BN, f32)."""

    def bn_apply(y, bnp):
        g, b, m, v = bnp
        inv = g / jnp.sqrt(v + eps)
        return y * inv[None, :, None, None] + (b - m * inv)[None, :, None, None]

    in_fts = x.shape[1]
    mid = expansion * in_fts
    dn = ("NCHW", "OIHW", "NCHW")
    if expansion != 1:
        w1 = jnp.transpose(params["w1"], (1, 0))[:, :, None, None]
        x = jax.lax.conv_general_dilated(x, w1, (1, 1), "VALID", dimension_numbers=dn)
        x = jnp.clip(bn_apply(x, params["bn1"]), 0.0, 6.0)
    wdw = jnp.transpose(params["w_dw"].reshape(3, 3, mid), (2, 0, 1))[:, None, :, :]
    y = jax.lax.conv_general_dilated(
        x, wdw, (2, 2), ((1, 1), (1, 1)), dimension_numbers=dn, feature_group_count=mid
    )
    y = jnp.clip(bn_apply(y, params["bn2"]), 0.0, 6.0)
    wpw = jnp.transpose(params["w_pw"], (1, 0))[:, :, None, None]
    y = jax.lax.conv_general_dilated(y, wpw, (1, 1), "VALID", dimension_numbers=dn)
    return bn_apply(y, params["bn3"])


if __name__ == "__main__":
    key = jax.random.PRNGKey(0)
    kx, kp, kx2, kp2 = jax.random.split(key, 4)

    # Test 1: expansion != 1 (the common MobileNetV2 case).
    in_fts, out_fts, expansion = 4, 8, 6
    x = jax.random.normal(kx, (2, in_fts, 16, 16), jnp.float32)     # NCHW like PyTorch
    params = init_params(kp, in_fts, out_fts, expansion)
    out = jax.block_until_ready(bottleneck_stride_two(x, params, expansion))
    assert out.shape == (2, out_fts, 8, 8), out.shape
    ref = reference(x, params, expansion)
    # bf16 MXU inputs -> loosened tolerance (still far tighter than any structural bug).
    if not jnp.allclose(out, ref, atol=1e-1, rtol=1e-1):
        err = float(jnp.max(jnp.abs(out - ref)))
        raise AssertionError(f"Pallas result mismatch (expansion=6), max abs err={err}")

    # Test 2: expansion == 1 (conv1 skipped, dw applied directly to the input).
    in2, out2 = 8, 16
    x2 = jax.random.normal(kx2, (1, in2, 8, 8), jnp.float32)
    params2 = init_params(kp2, in2, out2, 1)
    o2 = jax.block_until_ready(bottleneck_stride_two(x2, params2, 1))
    assert o2.shape == (1, out2, 4, 4), o2.shape
    r2 = reference(x2, params2, 1)
    if not jnp.allclose(o2, r2, atol=1e-1, rtol=1e-1):
        err = float(jnp.max(jnp.abs(o2 - r2)))
        raise AssertionError(f"Pallas result mismatch (expansion=1), max abs err={err}")

    print("KERNEL_OK")
</pallas_src>

<mosaic_0001>
module attributes {stable_mosaic.version = 11 : i64} {
  func.func @_fused_bottleneck_kernel(%arg0: i32, %arg1: i32, %arg2: memref<1x36x16x4xbf16, #tpu.memory_space<vmem>>, %arg3: memref<4x24xbf16, #tpu.memory_space<vmem>>, %arg4: memref<1x24xf32, #tpu.memory_space<vmem>>, %arg5: memref<9x24xf32, #tpu.memory_space<vmem>>, %arg6: memref<1x24xf32, #tpu.memory_space<vmem>>, %arg7: memref<24x8xbf16, #tpu.memory_space<vmem>>, %arg8: memref<1x8xf32, #tpu.memory_space<vmem>>, %arg9: memref<1x64x8xf32, #tpu.memory_space<vmem>>, %arg10: memref<36x16x24xf32, #tpu.memory_space<vmem>>) attributes {dimension_semantics = [#tpu.dimension_semantics<parallel>, #tpu.dimension_semantics<parallel>], iteration_bounds = array<i64: 2, 1>, scalar_prefetch = 0 : i64, scratch_operands = 1 : i64, tpu.core_type = #tpu.core_type<tc>, window_params = [{transform_indices = @transform_0, window_bounds = array<i64: 1, 36, 16, 4>}, {pipeline_mode = #tpu.pipeline_mode<synchronous>, transform_indices = @transform_1, window_bounds = array<i64: 4, 24>}, {pipeline_mode = #tpu.pipeline_mode<synchronous>, transform_indices = @transform_2, window_bounds = array<i64: 1, 24>}, {pipeline_mode = #tpu.pipeline_mode<synchronous>, transform_indices = @transform_3, window_bounds = array<i64: 9, 24>}, {pipeline_mode = #tpu.pipeline_mode<synchronous>, transform_indices = @transform_4, window_bounds = array<i64: 1, 24>}, {pipeline_mode = #tpu.pipeline_mode<synchronous>, transform_indices = @transform_5, window_bounds = array<i64: 24, 8>}, {pipeline_mode = #tpu.pipeline_mode<synchronous>, transform_indices = @transform_6, window_bounds = array<i64: 1, 8>}, {transform_indices = @transform_7, window_bounds = array<i64: 1, 64, 8>}]} {
    %c0 = arith.constant 0 : index
    %c0_0 = arith.constant 0 : index
    %c0_1 = arith.constant 0 : index
    %c0_2 = arith.constant 0 : index
    %0 = vector.load %arg2[%c0, %c0_0, %c0_1, %c0_2] : memref<1x36x16x4xbf16, #tpu.memory_space<vmem>>, vector<1x36x16x4xbf16>
    %1 = vector.shape_cast %0 : vector<1x36x16x4xbf16> to vector<36x16x4xbf16>
    %2 = vector.shape_cast %1 : vector<36x16x4xbf16> to vector<576x4xbf16>
    %c0_3 = arith.constant 0 : index
    %c0_4 = arith.constant 0 : index
    %3 = vector.load %arg3[%c0_3, %c0_4] : memref<4x24xbf16, #tpu.memory_space<vmem>>, vector<4x24xbf16>
    %cst = arith.constant dense<0.000000e+00> : vector<576x24xf32>
    %4 = tpu.matmul %2, %3, %cst {dimension_numbers = #tpu.dot_dimension_numbers<[1], [0], [0], [1], [0, 0, 1, 1], [], []>} : vector<576x4xbf16>, vector<4x24xbf16>, vector<576x24xf32> -> vector<576x24xf32>
    %c0_5 = arith.constant 0 : index
    %c0_6 = arith.constant 0 : index
    %5 = vector.load %arg4[%c0_5, %c0_6] : memref<1x24xf32, #tpu.memory_space<vmem>>, vector<1x24xf32>
    %6 = vector.broadcast %5 : vector<1x24xf32> to vector<576x24xf32>
    %7 = arith.addf %4, %6 : vector<576x24xf32>
    %cst_7 = arith.constant 0.000000e+00 : f32
    %cst_8 = arith.constant 6.000000e+00 : f32
    %8 = vector.broadcast %cst_7 : f32 to vector<576x24xf32>
    %9 = arith.maximumf %8, %7 : vector<576x24xf32>
    %10 = vector.broadcast %cst_8 : f32 to vector<576x24xf32>
    %11 = arith.minimumf %10, %9 : vector<576x24xf32>
    %12 = vector.shape_cast %11 : vector<576x24xf32> to vector<36x16x24xf32>
    %c0_9 = arith.constant 0 : index
    %c0_10 = arith.constant 0 : index
    %c0_11 = arith.constant 0 : index
    %13 = vector.load %arg10[%c0_9, %c0_10, %c0_11] : memref<36x16x24xf32, #tpu.memory_space<vmem>>, vector<36x16x24xf32>
    tpu.vector_store %arg10[%c0_9, %c0_10, %c0_11], %12 {strides = array<i32>} : memref<36x16x24xf32, #tpu.memory_space<vmem>>, vector<36x16x24xf32>,
    %c0_12 = arith.constant 0 : index
    %c0_13 = arith.constant 0 : index
    %14 = vector.load %arg5[%c0_12, %c0_13] : memref<9x24xf32, #tpu.memory_space<vmem>>, vector<9x24xf32>
    %cst_14 = arith.constant 0.000000e+00 : f32
    %15 = vector.broadcast %cst_14 : f32 to vector<8x8x24xf32>
    %c0_15 = arith.constant 0 : index
    %c0_16 = arith.constant 0 : index
    %c0_17 = arith.constant 0 : index
    %16 = vector.load %arg10[%c0_15, %c0_16, %c0_17] : memref<36x16x24xf32, #tpu.memory_space<vmem>>, vector<8x8x24xf32>
    %17 = vector.extract_strided_slice %14 {offsets = [0, 0], sizes = [1, 24], strides = [1, 1]} : vector<9x24xf32> to vector<1x24xf32>
    %18 = vector.shape_cast %17 : vector<1x24xf32> to vector<1x1x24xf32>
    %19 = vector.broadcast %18 : vector<1x1x24xf32> to vector<8x8x24xf32>
    %20 = arith.mulf %16, %19 : vector<8x8x24xf32>
    %21 = arith.addf %15, %20 : vector<8x8x24xf32>
    %c9 = arith.constant 9 : index
    %c0_18 = arith.constant 0 : index
    %c0_19 = arith.constant 0 : index
    %22 = vector.load %arg10[%c9, %c0_18, %c0_19] : memref<36x16x24xf32, #tpu.memory_space<vmem>>, vector<8x8x24xf32>
    %23 = vector.extract_strided_slice %14 {offsets = [1, 0], sizes = [1, 24], strides = [1, 1]} : vector<9x24xf32> to vector<1x24xf32>
    %24 = vector.shape_cast %23 : vector<1x24xf32> to vector<1x1x24xf32>
    %25 = vector.broadcast %24 : vector<1x1x24xf32> to vector<8x8x24xf32>
    %26 = arith.mulf %22, %25 : vector<8x8x24xf32>
    %27 = arith.addf %21, %26 : vector<8x8x24xf32>
    %c0_20 = arith.constant 0 : index
    %c1 = arith.constant 1 : index
    %c0_21 = arith.constant 0 : index
    %28 = vector.load %arg10[%c0_20, %c1, %c0_21] : memref<36x16x24xf32, #tpu.memory_space<vmem>>, vector<8x8x24xf32>
    %29 = vector.extract_strided_slice %14 {offsets = [2, 0], sizes = [1, 24], strides = [1, 1]} : vector<9x24xf32> to vector<1x24xf32>
    %30 = vector.shape_cast %29 : vector<1x24xf32> to vector<1x1x24xf32>
    %31 = vector.broadcast %30 : vector<1x1x24xf32> to vector<8x8x24xf32>
    %32 = arith.mulf %28, %31 : vector<8x8x24xf32>
    %33 = arith.addf %27, %32 : vector<8x8x24xf32>
    %c18 = arith.constant 18 : index
    %c0_22 = arith.constant 0 : index
    %c0_23 = arith.constant 0 : index
    %34 = vector.load %arg10[%c18, %c0_22, %c0_23] : memref<36x16x24xf32, #tpu.memory_space<vmem>>, vector<8x8x24xf32>
    %35 = vector.extract_strided_slice %14 {offsets = [3, 0], sizes = [1, 24], strides = [1, 1]} : vector<9x24xf32> to vector<1x24xf32>
    %36 = vector.shape_cast %35 : vector<1x24xf32> to vector<1x1x24xf32>
    %37 = vector.broadcast %36 : vector<1x1x24xf32> to vector<8x8x24xf32>
    %38 = arith.mulf %34, %37 : vector<8x8x24xf32>
    %39 = arith.addf %33, %38 : vector<8x8x24xf32>
    %c27 = arith.constant 27 : index
    %c0_24 = arith.constant 0 : index
    %c0_25 = arith.constant 0 : index
    %40 = vector.load %arg10[%c27, %c0_24, %c0_25] : memref<36x16x24xf32, #tpu.memory_space<vmem>>, vector<8x8x24xf32>
    %41 = vector.extract_strided_slice %14 {offsets = [4, 0], sizes = [1, 24], strides = [1, 1]} : vector<9x24xf32> to vector<1x24xf32>
    %42 = vector.shape_cast %41 : vector<1x24xf32> to vector<1x1x24xf32>
    %43 = vector.broadcast %42 : vector<1x1x24xf32> to vector<8x8x24xf32>
    %44 = arith.mulf %40, %43 : vector<8x8x24xf32>
    %45 = arith.addf %39, %44 : vector<8x8x24xf32>
    %c18_26 = arith.constant 18 : index
    %c1_27 = arith.constant 1 : index
    %c0_28 = arith.constant 0 : index
    %46 = vector.load %arg10[%c18_26, %c1_27, %c0_28] : memref<36x16x24xf32, #tpu.memory_space<vmem>>, vector<8x8x24xf32>
    %47 = vector.extract_strided_slice %14 {offsets = [5, 0], sizes = [1, 24], strides = [1, 1]} : vector<9x24xf32> to vector<1x24xf32>
    %48 = vector.shape_cast %47 : vector<1x24xf32> to vector<1x1x24xf32>
    %49 = vector.broadcast %48 : vector<1x1x24xf32> to vector<8x8x24xf32>
    %50 = arith.mulf %46, %49 : vector<8x8x24xf32>
    %51 = arith.addf %45, %50 : vector<8x8x24xf32>
    %c1_29 = arith.constant 1 : index
    %c0_30 = arith.constant 0 : index
    %c0_31 = arith.constant 0 : index
    %52 = vector.load %arg10[%c1_29, %c0_30, %c0_31] : memref<36x16x24xf32, #tpu.memory_space<vmem>>, vector<8x8x24xf32>
    %53 = vector.extract_strided_slice %14 {offsets = [6, 0], sizes = [1, 24], strides = [1, 1]} : vector<9x24xf32> to vector<1x24xf32>
    %54 = vector.shape_cast %53 : vector<1x24xf32> to vector<1x1x24xf32>
    %55 = vector.broadcast %54 : vector<1x1x24xf32> to vector<8x8x24xf32>
    %56 = arith.mulf %52, %55 : vector<8x8x24xf32>
    %57 = arith.addf %51, %56 : vector<8x8x24xf32>
    %c10 = arith.constant 10 : index
    %c0_32 = arith.constant 0 : index
    %c0_33 = arith.constant 0 : index
    %58 = vector.load %arg10[%c10, %c0_32, %c0_33] : memref<36x16x24xf32, #tpu.memory_space<vmem>>, vector<8x8x24xf32>
    %59 = vector.extract_strided_slice %14 {offsets = [7, 0], sizes = [1, 24], strides = [1, 1]} : vector<9x24xf32> to vector<1x24xf32>
    %60 = vector.shape_cast %59 : vector<1x24xf32> to vector<1x1x24xf32>
    %61 = vector.broadcast %60 : vector<1x1x24xf32> to vector<8x8x24xf32>
    %62 = arith.mulf %58, %61 : vector<8x8x24xf32>
    %63 = arith.addf %57, %62 : vector<8x8x24xf32>
    %c1_34 = arith.constant 1 : index
    %c1_35 = arith.constant 1 : index
    %c0_36 = arith.constant 0 : index
    %64 = vector.load %arg10[%c1_34, %c1_35, %c0_36] : memref<36x16x24xf32, #tpu.memory_space<vmem>>, vector<8x8x24xf32>
    %65 = vector.extract_strided_slice %14 {offsets = [8, 0], sizes = [1, 24], strides = [1, 1]} : vector<9x24xf32> to vector<1x24xf32>
    %66 = vector.shape_cast %65 : vector<1x24xf32> to vector<1x1x24xf32>
    %67 = vector.broadcast %66 : vector<1x1x24xf32> to vector<8x8x24xf32>
    %68 = arith.mulf %64, %67 : vector<8x8x24xf32>
    %69 = arith.addf %63, %68 : vector<8x8x24xf32>
    %c0_37 = arith.constant 0 : index
    %c0_38 = arith.constant 0 : index
    %70 = vector.load %arg6[%c0_37, %c0_38] : memref<1x24xf32, #tpu.memory_space<vmem>>, vector<1x24xf32>
    %71 = vector.shape_cast %70 : vector<1x24xf32> to vector<1x1x24xf32>
    %72 = vector.broadcast %71 : vector<1x1x24xf32> to vector<8x8x24xf32>
    %73 = arith.addf %69, %72 : vector<8x8x24xf32>
    %cst_39 = arith.constant 0.000000e+00 : f32
    %cst_40 = arith.constant 6.000000e+00 : f32
    %74 = vector.broadcast %cst_39 : f32 to vector<8x8x24xf32>
    %75 = arith.maximumf %74, %73 : vector<8x8x24xf32>
    %76 = vector.broadcast %cst_40 : f32 to vector<8x8x24xf32>
    %77 = arith.minimumf %76, %75 : vector<8x8x24xf32>
    %78 = vector.shape_cast %77 : vector<8x8x24xf32> to vector<64x24xf32>
    %79 = arith.truncf %78 : vector<64x24xf32> to vector<64x24xbf16>
    %c0_41 = arith.constant 0 : index
    %c0_42 = arith.constant 0 : index
    %80 = vector.load %arg7[%c0_41, %c0_42] : memref<24x8xbf16, #tpu.memory_space<vmem>>, vector<24x8xbf16>
    %cst_43 = arith.constant dense<0.000000e+00> : vector<64x8xf32>
    %81 = tpu.matmul %79, %80, %cst_43 {dimension_numbers = #tpu.dot_dimension_numbers<[1], [0], [0], [1], [0, 0, 1, 1], [], []>} : vector<64x24xbf16>, vector<24x8xbf16>, vector<64x8xf32> -> vector<64x8xf32>
    %c0_44 = arith.constant 0 : index
    %c0_45 = arith.constant 0 : index
    %82 = vector.load %arg8[%c0_44, %c0_45] : memref<1x8xf32, #tpu.memory_space<vmem>>, vector<1x8xf32>
    %83 = vector.broadcast %82 : vector<1x8xf32> to vector<64x8xf32>
    %84 = arith.addf %81, %83 : vector<64x8xf32>
    %c0_46 = arith.constant 0 : index
    %c0_47 = arith.constant 0 : index
    %c0_48 = arith.constant 0 : index
    %85 = vector.load %arg9[%c0_46, %c0_47, %c0_48] : memref<1x64x8xf32, #tpu.memory_space<vmem>>, vector<1x64x8xf32>
    %86 = vector.shape_cast %85 : vector<1x64x8xf32> to vector<64x8xf32>
    %87 = vector.shape_cast %84 : vector<64x8xf32> to vector<1x64x8xf32>
    tpu.vector_store %arg9[%c0_46, %c0_47, %c0_48], %87 {strides = array<i32>} : memref<1x64x8xf32, #tpu.memory_space<vmem>>, vector<1x64x8xf32>,
    return
  }
  func.func @transform_0(%arg0: i32, %arg1: i32) -> (i32, i32, i32, i32) {
    %c0_i32 = arith.constant 0 : i32
    %c0_i32_0 = arith.constant 0 : i32
    %c0_i32_1 = arith.constant 0 : i32
    return %arg0, %arg1, %c0_i32, %c0_i32_0 : i32, i32, i32, i32
  }
  func.func @transform_1(%arg0: i32, %arg1: i32) -> (i32, i32) {
    %c0_i32 = arith.constant 0 : i32
    %c0_i32_0 = arith.constant 0 : i32
    %c0_i32_1 = arith.constant 0 : i32
    return %c0_i32, %c0_i32_0 : i32, i32
  }
  func.func @transform_2(%arg0: i32, %arg1: i32) -> (i32, i32) {
    %c0_i32 = arith.constant 0 : i32
    %c0_i32_0 = arith.constant 0 : i32
    %c0_i32_1 = arith.constant 0 : i32
    return %c0_i32, %c0_i32_0 : i32, i32
  }
  func.func @transform_3(%arg0: i32, %arg1: i32) -> (i32, i32) {
    %c0_i32 = arith.constant 0 : i32
    %c0_i32_0 = arith.constant 0 : i32
    %c0_i32_1 = arith.constant 0 : i32
    return %c0_i32, %c0_i32_0 : i32, i32
  }
  func.func @transform_4(%arg0: i32, %arg1: i32) -> (i32, i32) {
    %c0_i32 = arith.constant 0 : i32
    %c0_i32_0 = arith.constant 0 : i32
    %c0_i32_1 = arith.constant 0 : i32
    return %c0_i32, %c0_i32_0 : i32, i32
  }
  func.func @transform_5(%arg0: i32, %arg1: i32) -> (i32, i32) {
    %c0_i32 = arith.constant 0 : i32
    %c0_i32_0 = arith.constant 0 : i32
    %c0_i32_1 = arith.constant 0 : i32
    return %c0_i32, %c0_i32_0 : i32, i32
  }
  func.func @transform_6(%arg0: i32, %arg1: i32) -> (i32, i32) {
    %c0_i32 = arith.constant 0 : i32
    %c0_i32_0 = arith.constant 0 : i32
    %c0_i32_1 = arith.constant 0 : i32
    return %c0_i32, %c0_i32_0 : i32, i32
  }
  func.func @transform_7(%arg0: i32, %arg1: i32) -> (i32, i32, i32) {
    %c0_i32 = arith.constant 0 : i32
    %c0_i32_0 = arith.constant 0 : i32
    return %arg0, %arg1, %c0_i32 : i32, i32, i32
  }
}

</mosaic_0001>

<bundles_post_ra>
// kernel: tpu_custom_call.1
= control target key start
LH: loop header
LB: loop body
LE: loop exit
PB: predicated region body
PF: predicated region fallthrough
CT: control target
= control target key end

     0   :  { %s2080_s24 = smov 0   ;;  %s2082_s25 = smov 0   ;;  %s2574_s0 = inlined_call_operand.vmem [shape: bf16[2,36,16,4], index: 0, kind: input, shape index: {}]   ;;  %s2575_s1 = inlined_call_operand.vmem [shape: bf16[4,24], index: 1, kind: input, shape index: {}]   ;;  %s2576_s2 = inlined_call_operand.vmem [shape: f32[1,24], index: 2, kind: input, shape index: {}]   ;;  %s2577_s3 = inlined_call_operand.vmem [shape: f32[9,24], index: 3, kind: input, shape index: {}]   ;;  %s2578_s4 = inlined_call_operand.vmem [shape: f32[1,24], index: 4, kind: input, shape index: {}]   ;;  %s2579_s5 = inlined_call_operand.vmem [shape: bf16[24,8], index: 5, kind: input, shape index: {}]   ;;  %s2580_s6 = inlined_call_operand.vmem [shape: f32[1,8], index: 6, kind: input, shape index: {}]   ;;  %s2581_s7 = inlined_call_operand.vmem [shape: f32[2,64,8], index: 7, kind: output, shape index: {}]  }
   0x1   :  { %s2084_s26 = smov 0  }
   0x2 LB: > { %s29_s27 = sadd.s32 1, %s2034_s25  ;;  %p1730_p0 = scmp.ge.s32.totalorder %s2038_s26, 1  ;;  %s2038_s26 = sphi %s2084_s26, %s17_s26   ;;  %s2034_s25 = sphi %s2082_s25, %s2586_s25   ;;  %s2030_s24 = sphi %s2080_s24, %s2585_s24  }
   0x3   : > { %p31_p1 = scmp.ge.s32.totalorder %s29_s27, 2  ;;  %p259_p2 = scmp.lt.s32.totalorder %s2038_s26, 3 }
   0x5   : > { %s2588_s27 = smov (%p31_p1, %s29_s27), 0  ;;  %p260_p3 = pnand %p1730_p0, %p259_p2 }
   0x7   : > { %263 = sbr.rel (%p260_p3) target bundleno = 570 (0x23a), region = 48 }
   0xe   : > { %v394_v0 = vld [vmem:[%s2575_s1] sm:$0x3]  ;;  %vm691_vm0 = vcmask 1041408   ;;  %p301_p4 = scmp.lt.s32.totalorder %s2030_s24, 1  ;;  %vm582_vm1 = vcmask 31744   ;;  %vm1558_vm2 = vcmask 1043456  }
   0xf   : > { %1950 = vmatprep.subr.msk.bf16.mxu0 %vm691_vm0, %v394_v0  ;;  %v693_v1 = vsel %vm691_vm0, %v394_v0, 0  ;;  %1951 = vmatprep.subr.msk.bf16.mxu1 %vm691_vm0, %v394_v0  ;;  %v2014_v38 = vld [vmem:[%s2579_s5] sm:$0xff]   ;;  %v2015_v39 = vld [vmem:[%s2579_s5 + $0x8] ss:$0 sps:$4 sm:$0xff]   ;;  %vm1160_vm3 = vcmask 195584   ;;  %vm1627_vm4 = vcmask 64512  }
  0x10   : > { %1863 = vmatpush3.bf16.msra.mxu0 %v693_v1  ;;  %s2590_s24 = smov (!%p301_p4, %s2030_s24), 1  ;;  %1949 = vmatpush3.bf16.msra.mxu1 %v693_v1  ;;  %v1560_v40 = vsel %vm1558_vm2, %v2015_v39, 0  ;;  %v2190_v41 = vld [vmem:[%s2576_s2] ss:$0 sm:$0xff] }
  0x11   : > { %s1953_s30 = smul.u32 288, %s2590_s24  ;;  %1936 = vmatprep.subr.bf16.mxu1 %v2014_v38  ;;  %s1818_s23 = sshll.u32 %s2590_s24, 6 }
  0x12   : > { %s319_s9 = scalar_lea.vmem %s2581_s7, %s1818_s23 }
  0x13   : > { %s2107_s10 = scalar_lea.vmem %s2574_s0, %s1953_s30 }
  0x14   : > { %v1978_v2 = vld [vmem:[%s2107_s10] sm:$0xff]   ;;  %v1979_v3 = vld [vmem:[%s2107_s10 + $0x8] sm:$0xff]   ;;  %v1980_v4 = vld [vmem:[%s2107_s10 + $0x10] sm:$0xff]  }
  0x15   : > { %1864 = vmatprep.mubr.msk.bf16.mxu0 %vm582_vm1, %v1978_v2  ;;  %v1982_v5 = vld [vmem:[%s2107_s10 + $0xa0] sm:$0xff]   ;;  %v1983_v6 = vld [vmem:[%s2107_s10 + $0xa8] sm:$0xff]   ;;  %v1981_v7 = vld [vmem:[%s2107_s10 + $0x18] sm:$0xff]  }
  0x16   : > { %1865 = vmatmul.mubr.msk.bf16.vlgmr.msra.gmra.mrb[0].mxu0 %vm582_vm1, %v1979_v3  ;;  %1904 = vmatprep.mubr.msk.bf16.mxu1 %vm582_vm1, %v1982_v5  ;;  %v1984_v8 = vld [vmem:[%s2107_s10 + $0x20] sm:$0xff]   ;;  %v1986_v9 = vld [vmem:[%s2107_s10 + $0xb0] sm:$0xff]   ;;  %v1987_v10 = vld [vmem:[%s2107_s10 + $0xb8] sm:$0xff]  }
  0x17   : > { %1868 = vmatprep.mubr.msk.bf16.mxu0 %vm582_vm1, %v1980_v4  ;;  %1905 = vmatmul.mubr.msk.bf16.vlgmr.msra.gmra.mrb[0].mxu1 %vm582_vm1, %v1983_v6  ;;  %v1990_v11 = vld [vmem:[%s2107_s10 + $0xc0] sm:$0xff]   ;;  %v1985_v12 = vld [vmem:[%s2107_s10 + $0x28] sm:$0xff]   ;;  %v1988_v13 = vld [vmem:[%s2107_s10 + $0x30] sm:$0xff]  }
  0x18   : > { %1908 = vmatprep.mubr.msk.bf16.mxu1 %vm582_vm1, %v1986_v9  ;;  %v1991_v14 = vld [vmem:[%s2107_s10 + $0xc8] sm:$0xff]   ;;  %v1994_v15 = vld [vmem:[%s2107_s10 + $0xd0] sm:$0xff]   ;;  %v1989_v16 = vld [vmem:[%s2107_s10 + $0x38] sm:$0xff]   ;;  %1937 = vmatpush3.bf16.msra.mxu1 %v2014_v38 }
  0x19   : > { %v1992_v17 = vld [vmem:[%s2107_s10 + $0x40] sm:$0xff]   ;;  %v1995_v18 = vld [vmem:[%s2107_s10 + $0xd8] sm:$0xff]   ;;  %v1993_v20 = vld [vmem:[%s2107_s10 + $0x48] sm:$0xff]   ;;  %1952 = vmatprep.subr.msk.bf16.mxu1 %vm1558_vm2, %v2015_v39 }
  0x1a   : > { %v1998_v19 = vld [vmem:[%s2107_s10 + $0xe0] sm:$0xff]   ;;  %v1996_v21 = vld [vmem:[%s2107_s10 + $0x50] sm:$0xff]   ;;  %v1999_v22 = vld [vmem:[%s2107_s10 + $0xe8] sm:$0xff]  }
  0x1b   : > { %v2002_v23 = vld [vmem:[%s2107_s10 + $0xf0] sm:$0xff]   ;;  %v1997_v24 = vld [vmem:[%s2107_s10 + $0x58] sm:$0xff]   ;;  %v2000_v25 = vld [vmem:[%s2107_s10 + $0x60] sm:$0xff]  }
  0x1c   : > { %v2003_v26 = vld [vmem:[%s2107_s10 + $0xf8] sm:$0xff]   ;;  %v2006_v27 = vld [vmem:[%s2107_s10 + $0x100] sm:$0xff]   ;;  %v2001_v28 = vld [vmem:[%s2107_s10 + $0x68] sm:$0xff]   ;;  %1939 = vmatpush3.bf16.msra.mxu1 %v1560_v40 }
  0x1d   : > { %v2004_v29 = vld [vmem:[%s2107_s10 + $0x70] sm:$0xff]   ;;  %v2007_v30 = vld [vmem:[%s2107_s10 + $0x108] sm:$0xff]   ;;  %v2005_v32 = vld [vmem:[%s2107_s10 + $0x78] sm:$0xff]  }
  0x1e   : > { %1869 = vmatmul.mubr.msk.bf16.gmra.mrb[4].mxu0 %vm582_vm1, %v1981_v7  ;;  %v2010_v31 = vld [vmem:[%s2107_s10 + $0x110] sm:$0xff]   ;;  %v2008_v33 = vld [vmem:[%s2107_s10 + $0x80] sm:$0xff]   ;;  %v2011_v34 = vld [vmem:[%s2107_s10 + $0x118] sm:$0xff]  }
  0x1f   : > { %1872 = vmatprep.mubr.msk.bf16.mxu0 %vm582_vm1, %v1984_v8  ;;  %1909 = vmatmul.mubr.msk.bf16.gmra.mrb[4].mxu1 %vm582_vm1, %v1987_v10  ;;  %v2009_v35 = vld [vmem:[%s2107_s10 + $0x88] sm:$0xff]   ;;  %v2012_v36 = vld [vmem:[%s2107_s10 + $0x90] sm:$0xff]   ;;  %v2013_v37 = vld [vmem:[%s2107_s10 + $0x98] sm:$0xff]  }
  0x20   : > { %1912 = vmatprep.mubr.msk.bf16.mxu1 %vm582_vm1, %v1990_v11 }
  0x26   : > { %1873 = vmatmul.mubr.msk.bf16.gmra.mrb[8].mxu0 %vm582_vm1, %v1985_v12 }
  0x27   : > { %1876 = vmatprep.mubr.msk.bf16.mxu0 %vm582_vm1, %v1988_v13  ;;  %1913 = vmatmul.mubr.msk.bf16.gmra.mrb[8].mxu1 %vm582_vm1, %v1991_v14 }
  0x28   : > { %1916 = vmatprep.mubr.msk.bf16.mxu1 %vm582_vm1, %v1994_v15 }
  0x2e   : > { %1877 = vmatmul.mubr.msk.bf16.gmra.mrb[12].mxu0 %vm582_vm1, %v1989_v16 }
  0x2f   : > { %1880 = vmatprep.mubr.msk.bf16.mxu0 %vm582_vm1, %v1992_v17  ;;  %1917 = vmatmul.mubr.msk.bf16.gmra.mrb[12].mxu1 %vm582_vm1, %v1995_v18 }
  0x30   : > { %1920 = vmatprep.mubr.msk.bf16.mxu1 %vm582_vm1, %v1998_v19 }
  0x36   : > { %1881 = vmatmul.mubr.msk.bf16.gmra.mrb[16].mxu0 %vm582_vm1, %v1993_v20 }
  0x37   : > { %1884 = vmatprep.mubr.msk.bf16.mxu0 %vm582_vm1, %v1996_v21  ;;  %1921 = vmatmul.mubr.msk.bf16.gmra.mrb[16].mxu1 %vm582_vm1, %v1999_v22 }
  0x38   : > { %1924 = vmatprep.mubr.msk.bf16.mxu1 %vm582_vm1, %v2002_v23 }
  0x3e   : > { %1885 = vmatmul.mubr.msk.bf16.gmra.mrb[20].mxu0 %vm582_vm1, %v1997_v24 }
  0x3f   : > { %1888 = vmatprep.mubr.msk.bf16.mxu0 %vm582_vm1, %v2000_v25  ;;  %1925 = vmatmul.mubr.msk.bf16.gmra.mrb[20].mxu1 %vm582_vm1, %v2003_v26  ;;  %v1243_v25 = vlaneseq }
  0x40   : > { %1928 = vmatprep.mubr.msk.bf16.mxu1 %vm582_vm1, %v2006_v27 }
  0x46   : > { %1889 = vmatmul.mubr.msk.bf16.gmra.mrb[24].mxu0 %vm582_vm1, %v2001_v28 }
  0x47   : > { %1892 = vmatprep.mubr.msk.bf16.mxu0 %vm582_vm1, %v2004_v29  ;;  %1929 = vmatmul.mubr.msk.bf16.gmra.mrb[24].mxu1 %vm582_vm1, %v2007_v30 }
  0x48   : > { %1932 = vmatprep.mubr.msk.bf16.mxu1 %vm582_vm1, %v2010_v31 }
  0x4e   : > { %1893 = vmatmul.mubr.msk.bf16.gmra.mrb[28].mxu0 %vm582_vm1, %v2005_v32 }
  0x4f   : > { %1896 = vmatprep.mubr.msk.bf16.mxu0 %vm582_vm1, %v2008_v33  ;;  %1933 = vmatmul.mubr.msk.bf16.gmra.mrb[28].mxu1 %vm582_vm1, %v2011_v34 }
  0x56   : > { %1897 = vmatmul.mubr.msk.bf16.gmra.mrb[32].mxu0 %vm582_vm1, %v2009_v35 }
  0x57   : > { %1900 = vmatprep.mubr.msk.bf16.mxu0 %vm582_vm1, %v2012_v36 }
  0x5e   : > { %1901 = vmatmul.mubr.msk.bf16.gmra.mrb[36].mxu0 %vm582_vm1, %v2013_v37 }
  0xe9   : > { %v1866_v42 = vpop.f32.mrb[0].mxu0 }
  0xea   : > { %v738_v43 = vadd.f32 %v1866_v42, %v2190_v41  ;;  %v729_v44 = vpop.f32.mrb[1].mxu0  ;;  %v1906_v52 = vpop.f32.mrb[0].mxu1 }
  0xeb   : > { %v730_v45 = vadd.f32 %v2190_v41, %v729_v44  ;;  %v1867_v46 = vpop.f32.mrb[2].mxu0  ;;  %v898_v55 = vadd.f32 %v1906_v52, %v2190_v41  ;;  %v889_v56 = vpop.f32.mrb[1].mxu1 }
  0xec   : > { %v1018_v47 = vmax.f32 %v738_v43, 0.0  ;;  %v741_v48 = vadd.f32 %v1867_v46, %v2190_v41  ;;  %v732_v49 = vpop.f32.mrb[3].mxu0  ;;  %v890_v59 = vadd.f32 %v2190_v41, %v889_v56  ;;  %v1907_v60 = vpop.f32.mrb[2].mxu1  ;;  %v2220_v43 = vshrl.u32 %v1243_v25, 7 }
  0xed   : > { %v1016_v50 = vmax.f32 %v730_v45, 0.0  ;;  %v733_v51 = vadd.f32 %v2190_v41, %v732_v49  ;;  %v1058_v62 = vmax.f32 %v898_v55, 0.0  ;;  %v901_v63 = vadd.f32 %v1907_v60, %v2190_v41  ;;  %v892_v0 = vpop.f32.mrb[3].mxu1 }
  0xee   : > { %v1090_v53 = vmin.f32 %v1018_v47, 6.0  ;;  %v1019_v54 = vmax.f32 %v741_v48, 0.0  ;;  %v1056_v3 = vmax.f32 %v890_v59, 0.0  ;;  %v893_v4 = vadd.f32 %v2190_v41, %v892_v0 }
  0xef   : > { %v1088_v57 = vmin.f32 %v1016_v50, 6.0  ;;  %v1017_v58 = vmax.f32 %v733_v51, 0.0  ;;  %v1130_v7 = vmin.f32 %v1058_v62, 6.0  ;;  %v1059_v8 = vmax.f32 %v901_v63, 0.0 }
  0xf0   : > { %1163 = vst.msk [vmem:[#allocation2 + $0x10] sm:$0xff] %vm1160_vm3, %v1090_v53  ;;  %v1091_v61 = vmin.f32 %v1019_v54, 6.0  ;;  %v1128_v11 = vmin.f32 %v1056_v3, 6.0  ;;  %v1057_v12 = vmax.f32 %v893_v4, 0.0  ;;  %v1245_v60 = vsub.s32 0, %v2220_v43 }
  0xf1   : > { %1161 = vst.msk [vmem:[#allocation2] sm:$0xff] %vm1160_vm3, %v1088_v57  ;;  %v1089_v1 = vmin.f32 %v1017_v58, 6.0  ;;  %v1870_v2 = vpop.f32.mrb[4].mxu0  ;;  %1203 = vst.msk [vmem:[#allocation2 + $0x150] sm:$0xff] %vm1160_vm3, %v1130_v7  ;;  %v1131_v16 = vmin.f32 %v1059_v8, 6.0  ;;  %v1331_v25 = vsub.s32 3, %v2220_v43 }
  0xf2   : > { %1164 = vst.msk [vmem:[#allocation2 + $0x18] sm:$0xff] %vm1160_vm3, %v1091_v61  ;;  %v754_v5 = vadd.f32 %v1870_v2, %v2190_v41  ;;  %v745_v6 = vpop.f32.mrb[5].mxu0  ;;  %1201 = vst.msk [vmem:[#allocation2 + $0x140] sm:$0xff] %vm1160_vm3, %v1128_v11  ;;  %v1129_v19 = vmin.f32 %v1057_v12, 6.0  ;;  %v1910_v20 = vpop.f32.mrb[4].mxu1 }
  0xf3   : > { %1162 = vst.msk [vmem:[#allocation2 + $0x8] sm:$0xff] %vm1160_vm3, %v1089_v1  ;;  %v746_v9 = vadd.f32 %v2190_v41, %v745_v6  ;;  %v1871_v10 = vpop.f32.mrb[6].mxu0  ;;  %1204 = vst.msk [vmem:[#allocation2 + $0x158] sm:$0xff] %vm1160_vm3, %v1131_v16  ;;  %v914_v23 = vadd.f32 %v1910_v20, %v2190_v41  ;;  %v905_v24 = vpop.f32.mrb[5].mxu1  ;;  %v2236_v1 = vld [vmem:[%s2577_s3] sm:$0xff] }
  0xf4   : > { %v1022_v13 = vmax.f32 %v754_v5, 0.0  ;;  %v757_v14 = vadd.f32 %v1871_v10, %v2190_v41  ;;  %v748_v15 = vpop.f32.mrb[7].mxu0  ;;  %1202 = vst.msk [vmem:[#allocation2 + $0x148] sm:$0xff] %vm1160_vm3, %v1129_v19  ;;  %v906_v28 = vadd.f32 %v2190_v41, %v905_v24  ;;  %v1911_v29 = vpop.f32.mrb[6].mxu1  ;;  %v1417_v10 = vsub.s32 6, %v2220_v43 }
  0xf5   : > { %v1020_v17 = vmax.f32 %v746_v9, 0.0  ;;  %v749_v18 = vadd.f32 %v2190_v41, %v748_v15  ;;  %v1062_v31 = vmax.f32 %v914_v23, 0.0  ;;  %v917_v32 = vadd.f32 %v1911_v29, %v2190_v41  ;;  %v908_v33 = vpop.f32.mrb[7].mxu1 }
  0xf6   : > { %v1094_v21 = vmin.f32 %v1022_v13, 6.0  ;;  %v1023_v22 = vmax.f32 %v757_v14, 0.0  ;;  %v1060_v36 = vmax.f32 %v906_v28, 0.0  ;;  %v909_v37 = vadd.f32 %v2190_v41, %v908_v33 }
  0xf7   : > { %v1092_v26 = vmin.f32 %v1020_v17, 6.0  ;;  %v1021_v27 = vmax.f32 %v749_v18, 0.0  ;;  %v1134_v40 = vmin.f32 %v1062_v31, 6.0  ;;  %v1063_v42 = vmax.f32 %v917_v32, 0.0 }
  0xf8   : > { %1167 = vst.msk [vmem:[#allocation2 + $0x30] sm:$0xff] %vm1160_vm3, %v1094_v21  ;;  %v1095_v30 = vmin.f32 %v1023_v22, 6.0  ;;  %v1132_v46 = vmin.f32 %v1060_v36, 6.0  ;;  %v1061_v47 = vmax.f32 %v909_v37, 0.0  ;;  %v1302_v15 = vsub.s32 2, %v2220_v43 }
  0xf9   : > { %1165 = vst.msk [vmem:[#allocation2 + $0x20] sm:$0xff] %vm1160_vm3, %v1092_v26  ;;  %v1093_v34 = vmin.f32 %v1021_v27, 6.0  ;;  %v1874_v35 = vpop.f32.mrb[8].mxu0  ;;  %1207 = vst.msk [vmem:[#allocation2 + $0x170] sm:$0xff] %vm1160_vm3, %v1134_v40  ;;  %v1135_v51 = vmin.f32 %v1063_v42, 6.0  ;;  %v2247_v16 = vrot.slane %v2236_v1, %v1245_v60 }
  0xfa   : > { %1168 = vst.msk [vmem:[#allocation2 + $0x38] sm:$0xff] %vm1160_vm3, %v1095_v30  ;;  %v770_v38 = vadd.f32 %v1874_v35, %v2190_v41  ;;  %v761_v39 = vpop.f32.mrb[9].mxu0  ;;  %1205 = vst.msk [vmem:[#allocation2 + $0x160] sm:$0xff] %vm1160_vm3, %v1132_v46  ;;  %v1133_v54 = vmin.f32 %v1061_v47, 6.0  ;;  %v1914_v55 = vpop.f32.mrb[8].mxu1  ;;  %v2257_v30 = vrot.slane %v2236_v1, %v1417_v10  ;;  %v2262_v35 = vrot.slane %v2236_v1, %v1302_v15 }
  0xfb   : > { %1166 = vst.msk [vmem:[#allocation2 + $0x28] sm:$0xff] %vm1160_vm3, %v1093_v34  ;;  %v762_v44 = vadd.f32 %v2190_v41, %v761_v39  ;;  %v1875_v45 = vpop.f32.mrb[10].mxu0  ;;  %1208 = vst.msk [vmem:[#allocation2 + $0x178] sm:$0xff] %vm1160_vm3, %v1135_v51  ;;  %v930_v58 = vadd.f32 %v1914_v55, %v2190_v41  ;;  %v921_v59 = vpop.f32.mrb[9].mxu1  ;;  %v1388_v39 = vsub.s32 5, %v2220_v43  ;;  %v1360_v55 = vsub.s32 4, %v2220_v43 }
  0xfc   : > { %v1026_v48 = vmax.f32 %v770_v38, 0.0  ;;  %v773_v49 = vadd.f32 %v1875_v45, %v2190_v41  ;;  %v764_v50 = vpop.f32.mrb[11].mxu0  ;;  %1206 = vst.msk [vmem:[#allocation2 + $0x168] sm:$0xff] %vm1160_vm3, %v1133_v54  ;;  %v922_v63 = vadd.f32 %v2190_v41, %v921_v59  ;;  %v1915_v0 = vpop.f32.mrb[10].mxu1  ;;  %v2268_v45 = vrot.slane %v2236_v1, %v1331_v25 }
  0xfd   : > { %v1024_v52 = vmax.f32 %v762_v44, 0.0  ;;  %v765_v53 = vadd.f32 %v2190_v41, %v764_v50  ;;  %v1066_v3 = vmax.f32 %v930_v58, 0.0  ;;  %v933_v4 = vadd.f32 %v1915_v0, %v2190_v41  ;;  %v924_v5 = vpop.f32.mrb[11].mxu1 }
  0xfe   : > { %v1098_v56 = vmin.f32 %v1026_v48, 6.0  ;;  %v1027_v57 = vmax.f32 %v773_v49, 0.0  ;;  %v1064_v8 = vmax.f32 %v922_v63, 0.0  ;;  %v925_v9 = vadd.f32 %v2190_v41, %v924_v5  ;;  %v1236_v63 = vld [vmem:[#allocation2 + $0x10] sm:$0xff] }
  0xff   : > { %v1096_v61 = vmin.f32 %v1024_v52, 6.0  ;;  %v1025_v62 = vmax.f32 %v765_v53, 0.0  ;;  %v1138_v13 = vmin.f32 %v1066_v3, 6.0  ;;  %v1067_v14 = vmax.f32 %v933_v4, 0.0 }
 0x100   : > { %1171 = vst.msk [vmem:[#allocation2 + $0x50] sm:$0xff] %vm1160_vm3, %v1098_v56  ;;  %v1099_v2 = vmin.f32 %v1027_v57, 6.0  ;;  %v1136_v19 = vmin.f32 %v1064_v8, 6.0  ;;  %v1065_v20 = vmax.f32 %v925_v9, 0.0  ;;  %v1274_v48 = vsub.s32 1, %v2220_v43  ;;  %v2291_v9 = vld [vmem:[#allocation2 + $0x11] sm:$0xff] }
 0x101   : > { %1169 = vst.msk [vmem:[#allocation2 + $0x40] sm:$0xff] %vm1160_vm3, %v1096_v61  ;;  %v1097_v6 = vmin.f32 %v1025_v62, 6.0  ;;  %v1878_v7 = vpop.f32.mrb[12].mxu0  ;;  %1211 = vst.msk [vmem:[#allocation2 + $0x190] sm:$0xff] %vm1160_vm3, %v1138_v13  ;;  %v1139_v24 = vmin.f32 %v1067_v14, 6.0  ;;  %v1446_v52 = vsub.s32 7, %v2220_v43  ;;  %v2280_v58 = vrot.slane %v2236_v1, %v1388_v39 }
 0x102   : > { %1172 = vst.msk [vmem:[#allocation2 + $0x58] sm:$0xff] %vm1160_vm3, %v1099_v2  ;;  %v786_v11 = vadd.f32 %v1878_v7, %v2190_v41  ;;  %v777_v12 = vpop.f32.mrb[13].mxu0  ;;  %1209 = vst.msk [vmem:[#allocation2 + $0x180] sm:$0xff] %vm1160_vm3, %v1136_v19  ;;  %v1137_v28 = vmin.f32 %v1065_v20, 6.0  ;;  %v1918_v29 = vpop.f32.mrb[12].mxu1  ;;  %v2284_v61 = vrot.slane %v2236_v1, %v1274_v48  ;;  %v1235_v43 = vld [vmem:[#allocation2] sm:$0xff]  ;;  %v2294_v10 = vrot.slane %v2236_v1, %v1360_v55 }
 0x103   : > { %1170 = vst.msk [vmem:[#allocation2 + $0x48] sm:$0xff] %vm1160_vm3, %v1097_v6  ;;  %v778_v17 = vadd.f32 %v2190_v41, %v777_v12  ;;  %v1879_v18 = vpop.f32.mrb[14].mxu0  ;;  %1212 = vst.msk [vmem:[#allocation2 + $0x198] sm:$0xff] %vm1160_vm3, %v1139_v24  ;;  %v946_v33 = vadd.f32 %v1918_v29, %v2190_v41  ;;  %v937_v34 = vpop.f32.mrb[13].mxu1  ;;  %v2288_v4 = vrot.slane %v2236_v1, %v1446_v52  ;;  %v1292_v14 = vld [vmem:[#allocation2 + $0x1] sm:$0xff]  ;;  %v1238_v29 = vld [vmem:[#allocation2 + $0x30] sm:$0xff] }
 0x104   : > { %v1030_v21 = vmax.f32 %v786_v11, 0.0  ;;  %v789_v22 = vadd.f32 %v1879_v18, %v2190_v41  ;;  %v780_v23 = vpop.f32.mrb[15].mxu0  ;;  %1210 = vst.msk [vmem:[#allocation2 + $0x188] sm:$0xff] %vm1160_vm3, %v1137_v28  ;;  %v1919_v38 = vpop.f32.mrb[14].mxu1  ;;  %2583 = vst [vmem:[#allocation3_spill] sm:$0xff] %v2291_v9  ;;  %v2298_v13 = vmul.f32 %v2247_v16, %v1236_v63  ;;  %v2302_v19 = vmul.f32 %v2247_v16, %v1235_v43  ;;  %v1324_v28 = vld [vmem:[#allocation2 + $0x150] sm:$0xff] }
 0x105   : > { %v1028_v26 = vmax.f32 %v778_v17, 0.0  ;;  %v781_v27 = vadd.f32 %v2190_v41, %v780_v23  ;;  %v1070_v42 = vmax.f32 %v946_v33, 0.0  ;;  %v940_v44 = vpop.f32.mrb[15].mxu1  ;;  %v1323_v23 = vld [vmem:[#allocation2 + $0x140] sm:$0xff]  ;;  %v2316_v33 = vmul.f32 %v2257_v30, %v1236_v63  ;;  %v1295_v52 = vld [vmem:[#allocation2 + $0x31] sm:$0xff] }
 0x106   : > { %v1102_v31 = vmin.f32 %v1030_v21, 6.0  ;;  %v1031_v32 = vmax.f32 %v789_v22, 0.0  ;;  %v2307_v22 = vmul.f32 %v2262_v35, %v2291_v9  ;;  %v1237_v34 = vld [vmem:[#allocation2 + $0x20] sm:$0xff]  ;;  %v2320_v38 = vmul.f32 %v2268_v45, %v1323_v23 }
 0x107   : > { %v1100_v36 = vmin.f32 %v1028_v26, 6.0  ;;  %v1029_v37 = vmax.f32 %v781_v27, 0.0  ;;  %v1142_v51 = vmin.f32 %v1070_v42, 6.0  ;;  %v2312_v27 = vmul.f32 %v2262_v35, %v1292_v14 }
 0x108   : > { %1175 = vst.msk [vmem:[#allocation2 + $0x70] sm:$0xff] %vm1160_vm3, %v1102_v31  ;;  %v1103_v40 = vmin.f32 %v1031_v32, 6.0  ;;  %v2324_v44 = vmul.f32 %v2268_v45, %v1324_v28 }
 0x109   : > { %1173 = vst.msk [vmem:[#allocation2 + $0x60] sm:$0xff] %vm1160_vm3, %v1100_v36  ;;  %v1101_v46 = vmin.f32 %v1029_v37, 6.0  ;;  %v1882_v47 = vpop.f32.mrb[16].mxu0  ;;  %1215 = vst.msk [vmem:[#allocation2 + $0x1b0] sm:$0xff] %vm1160_vm3, %v1142_v51  ;;  %v2333_v51 = vmul.f32 %v2247_v16, %v1237_v34 }
 0x10a   : > { %1176 = vst.msk [vmem:[#allocation2 + $0x78] sm:$0xff] %vm1160_vm3, %v1103_v40  ;;  %v802_v49 = vadd.f32 %v1882_v47, %v2190_v41  ;;  %v793_v50 = vpop.f32.mrb[17].mxu0  ;;  %v1922_v62 = vpop.f32.mrb[16].mxu1  ;;  %v2329_v47 = vld [vmem:[#allocation2 + $0x21] sm:$0xff] }
 0x10b   : > { %1174 = vst.msk [vmem:[#allocation2 + $0x68] sm:$0xff] %vm1160_vm3, %v1101_v46  ;;  %v794_v53 = vadd.f32 %v2190_v41, %v793_v50  ;;  %v1883_v54 = vpop.f32.mrb[18].mxu0  ;;  %v962_v2 = vadd.f32 %v1922_v62, %v2190_v41  ;;  %v953_v3 = vpop.f32.mrb[17].mxu1  ;;  %v2327_v46 = vmul.f32 %v2247_v16, %v1238_v29  ;;  %v1467_v23 = vld [vmem:[#allocation2 + $0x41] sm:$0xff] }
 0x10c   : > { %v1034_v56 = vmax.f32 %v802_v49, 0.0  ;;  %v796_v57 = vpop.f32.mrb[19].mxu0  ;;  %v954_v7 = vadd.f32 %v2190_v41, %v953_v3  ;;  %v1923_v8 = vpop.f32.mrb[18].mxu1 }
 0x10d   : > { %v1032_v59 = vmax.f32 %v794_v53, 0.0  ;;  %v797_v60 = vadd.f32 %v2190_v41, %v796_v57  ;;  %v1074_v11 = vmax.f32 %v962_v2, 0.0  ;;  %v956_v12 = vpop.f32.mrb[19].mxu1  ;;  %v2338_v57 = vmul.f32 %v2257_v30, %v1237_v34  ;;  %v1381_v2 = vld [vmem:[#allocation2 + $0x151] sm:$0xff] }
 0x10e   : > { %v1106_v0 = vmin.f32 %v1034_v56, 6.0  ;;  %v1072_v18 = vmax.f32 %v954_v7, 0.0  ;;  %v1410_v12 = vld [vmem:[#allocation2 + $0x40] sm:$0xff] }
 0x10f   : > { %v1104_v5 = vmin.f32 %v1032_v59, 6.0  ;;  %v1033_v6 = vmax.f32 %v797_v60, 0.0  ;;  %v1146_v21 = vmin.f32 %v1074_v11, 6.0  ;;  %v1380_v59 = vld [vmem:[#allocation2 + $0x141] sm:$0xff] }
 0x110   : > { %1179 = vst.msk [vmem:[#allocation2 + $0x90] sm:$0xff] %vm1160_vm3, %v1106_v0  ;;  %v1144_v26 = vmin.f32 %v1072_v18, 6.0  ;;  %v2343_v0 = vmul.f32 %v2262_v35, %v2329_v47  ;;  %v2351_v11 = vmul.f32 %v2280_v58, %v1380_v59 }
 0x111   : > { %1177 = vst.msk [vmem:[#allocation2 + $0x80] sm:$0xff] %vm1160_vm3, %v1104_v5  ;;  %v1105_v15 = vmin.f32 %v1033_v6, 6.0  ;;  %v1886_v17 = vpop.f32.mrb[20].mxu0  ;;  %1219 = vst.msk [vmem:[#allocation2 + $0x1d0] sm:$0xff] %vm1160_vm3, %v1146_v21  ;;  %v2347_v6 = vmul.f32 %v2262_v35, %v1295_v52  ;;  %v2359_v21 = vmul.f32 %v2257_v30, %v1238_v29 }
 0x112   : > { %v818_v20 = vadd.f32 %v1886_v17, %v2190_v41  ;;  %v809_v1 = vpop.f32.mrb[21].mxu0  ;;  %1217 = vst.msk [vmem:[#allocation2 + $0x1c0] sm:$0xff] %vm1160_vm3, %v1144_v26  ;;  %v1926_v37 = vpop.f32.mrb[20].mxu1  ;;  %v2355_v17 = vmul.f32 %v2280_v58, %v1381_v2 }
 0x113   : > { %1178 = vst.msk [vmem:[#allocation2 + $0x88] sm:$0xff] %vm1160_vm3, %v1105_v15  ;;  %v810_v24 = vadd.f32 %v2190_v41, %v809_v1  ;;  %v1887_v25 = vpop.f32.mrb[22].mxu0  ;;  %v978_v40 = vadd.f32 %v1926_v37, %v2190_v41  ;;  %v969_v42 = vpop.f32.mrb[21].mxu1 }
 0x114   : > { %v1038_v31 = vmax.f32 %v818_v20, 0.0  ;;  %v812_v32 = vpop.f32.mrb[23].mxu0  ;;  %v970_v49 = vadd.f32 %v2190_v41, %v969_v42  ;;  %v1927_v50 = vpop.f32.mrb[22].mxu1  ;;  %v2380_v42 = vld [vmem:[#allocation2 + $0x50] sm:$0xff] }
 0x115   : > { %v1036_v36 = vmax.f32 %v810_v24, 0.0  ;;  %v1078_v53 = vmax.f32 %v978_v40, 0.0  ;;  %v972_v54 = vpop.f32.mrb[23].mxu1  ;;  %v2370_v32 = vmul.f32 %v2257_v30, %v1410_v12 }
 0x116   : > { %v1110_v39 = vmin.f32 %v1038_v31, 6.0  ;;  %v1076_v56 = vmax.f32 %v970_v49, 0.0  ;;  %v2367_v31 = vld [vmem:[%s2577_s3 + $0x8] ss:$0 sm:$0xff] }
 0x117   : > { %v1108_v48 = vmin.f32 %v1036_v36, 6.0  ;;  %v1150_v63 = vmin.f32 %v1078_v53, 6.0  ;;  %v2374_v36 = vmul.f32 %v2367_v31, %v1295_v52  ;;  %v2378_v40 = vmul.f32 %v2367_v31, %v1467_v23 }
 0x118   : > { %1183 = vst.msk [vmem:[#allocation2 + $0xb0] sm:$0xff] %vm1160_vm3, %v1110_v39  ;;  %v1148_v5 = vmin.f32 %v1076_v56, 6.0  ;;  %v2387_v56 = vmul.f32 %v1410_v12, %v2247_v16 }
 0x119   : > { %1181 = vst.msk [vmem:[#allocation2 + $0xa0] sm:$0xff] %vm1160_vm3, %v1108_v48  ;;  %v1890_v55 = vpop.f32.mrb[24].mxu0  ;;  %1223 = vst.msk [vmem:[#allocation2 + $0x1f0] sm:$0xff] %vm1160_vm3, %v1150_v63  ;;  %v2394_v63 = vld [vmem:[#allocation2 + $0x51] sm:$0xff] }
 0x11a   : > { %v834_v60 = vadd.f32 %v1890_v55, %v2190_v41  ;;  %v825_v62 = vpop.f32.mrb[25].mxu0  ;;  %1221 = vst.msk [vmem:[#allocation2 + $0x1e0] sm:$0xff] %vm1160_vm3, %v1148_v5  ;;  %v1930_v15 = vpop.f32.mrb[24].mxu1  ;;  %v1325_v5 = vld [vmem:[#allocation2 + $0x160] sm:$0xff] }
 0x11b   : > { %v826_v3 = vadd.f32 %v2190_v41, %v825_v62  ;;  %v1891_v43 = vpop.f32.mrb[26].mxu0  ;;  %v994_v20 = vadd.f32 %v1930_v15, %v2190_v41  ;;  %v985_v1 = vpop.f32.mrb[25].mxu1  ;;  %v2392_v62 = vmul.f32 %v2247_v16, %v2380_v42 }
 0x11c   : > { %v1042_v7 = vmax.f32 %v834_v60, 0.0  ;;  %v828_v8 = vpop.f32.mrb[27].mxu0  ;;  %v986_v26 = vadd.f32 %v2190_v41, %v985_v1  ;;  %v1931_v28 = vpop.f32.mrb[26].mxu1  ;;  %v2398_v43 = vmul.f32 %v1467_v23, %v2262_v35  ;;  %v2410_v23 = vmul.f32 %v2268_v45, %v1325_v5  ;;  %v1350_v5 = vld [vmem:[#allocation2 + $0x1b0] sm:$0xff] }
 0x11d   : > { %v1040_v14 = vmax.f32 %v826_v3, 0.0  ;;  %v1082_v34 = vmax.f32 %v994_v20, 0.0  ;;  %v988_v29 = vpop.f32.mrb[27].mxu1  ;;  %v2404_v20 = vmul.f32 %v2262_v35, %v2394_v63 }
 0x11e   : > { %v1114_v18 = vmin.f32 %v1042_v7, 6.0  ;;  %v1080_v39 = vmax.f32 %v986_v26, 0.0 }
 0x11f   : > { %v2361_v24 = vld [vmem:[#allocation2 + $0xb0] sm:$0xff]  ;;  %v1112_v25 = vmin.f32 %v1040_v14, 6.0  ;;  %v1154_v53 = vmin.f32 %v1082_v34, 6.0 }
 0x120   : > { %1187 = vst.msk [vmem:[#allocation2 + $0xd0] sm:$0xff] %vm1160_vm3, %v1114_v18  ;;  %v1278_v48 = vmul.f32 %v2284_v61, %v2361_v24  ;;  %v1152_v55 = vmin.f32 %v1080_v39, 6.0  ;;  %v1326_v34 = vld [vmem:[#allocation2 + $0x170] sm:$0xff]  ;;  %v2457_v9 = vld [vmem:[#allocation2 + $0xa0] sm:$0xff] }
 0x121   : > { %1185 = vst.msk [vmem:[#allocation2 + $0xc0] sm:$0xff] %vm1160_vm3, %v1112_v25  ;;  %v1894_v37 = vpop.f32.mrb[28].mxu0  ;;  %1227 = vst.msk [vmem:[#allocation2 + $0x210] sm:$0xff] %vm1160_vm3, %v1154_v53 }
 0x122   : > { %v850_v49 = vadd.f32 %v1894_v37, %v2190_v41  ;;  %v841_v50 = vpop.f32.mrb[29].mxu0  ;;  %1225 = vst.msk [vmem:[#allocation2 + $0x200] sm:$0xff] %vm1160_vm3, %v1152_v55  ;;  %v1934_v3 = vpop.f32.mrb[28].mxu1  ;;  %v1286_v12 = vadd.f32 %v1278_v48, %v2333_v51  ;;  %v1382_v48 = vld [vmem:[#allocation2 + $0x161] sm:$0xff] }
 0x123   : > { %v842_v54 = vadd.f32 %v2190_v41, %v841_v50  ;;  %v1895_v52 = vpop.f32.mrb[30].mxu0  ;;  %v1001_v8 = vpop.f32.mrb[29].mxu1 }
 0x124   : > { %v1046_v59 = vmax.f32 %v850_v49, 0.0  ;;  %v844_v60 = vpop.f32.mrb[31].mxu0  ;;  %v1002_v15 = vadd.f32 %v2190_v41, %v1001_v8  ;;  %v1935_v18 = vpop.f32.mrb[30].mxu1  ;;  %v1314_v39 = vadd.f32 %v2343_v0, %v1286_v12  ;;  %v1383_v0 = vld [vmem:[#allocation2 + $0x171] sm:$0xff]  ;;  %v2424_v8 = vmul.f32 %v2280_v58, %v1382_v48 }
 0x125   : > { %v1044_v2 = vmax.f32 %v842_v54, 0.0  ;;  %v1004_v25 = vpop.f32.mrb[31].mxu1  ;;  %v1264_v54 = vld [vmem:[#allocation2 + $0x90] sm:$0xff]  ;;  %v2444_v48 = vmul.f32 %v2257_v30, %v2380_v42 }
 0x126   : > { %v1118_v7 = vmin.f32 %v1046_v59, 6.0  ;;  %v1084_v28 = vmax.f32 %v1002_v15, 0.0  ;;  %v1352_v60 = vld [vmem:[#allocation2 + $0x1d0] sm:$0xff]  ;;  %v1412_v15 = vld [vmem:[#allocation2 + $0x60] sm:$0xff]  ;;  %v1343_v25 = vadd.f32 %v2320_v38, %v1314_v39 }
 0x127   : > { %v1116_v14 = vmin.f32 %v1044_v2, 6.0  ;;  %v1338_v2 = vmul.f32 %v2268_v45, %v1326_v34  ;;  %v1354_v39 = vld [vmem:[#allocation2 + $0x1f0] sm:$0xff] }
 0x128   : > { %v2406_v1 = vld [vmem:[#allocation2 + $0xc0] sm:$0xff]  ;;  %1191 = vst.msk [vmem:[#allocation2 + $0xf0] sm:$0xff] %vm1160_vm3, %v1118_v7  ;;  %v1156_v53 = vmin.f32 %v1084_v28, 6.0  ;;  %v2421_v7 = vld [vmem:[#allocation2 + $0xd0] sm:$0xff]  ;;  %v2432_v28 = vmul.f32 %v2294_v10, %v1350_v5 }
 0x129   : > { %v1279_v26 = vmul.f32 %v2284_v61, %v2406_v1  ;;  %1189 = vst.msk [vmem:[#allocation2 + $0xe0] sm:$0xff] %vm1160_vm3, %v1116_v14  ;;  %v1898_v51 = vpop.f32.mrb[32].mxu0  ;;  %v1276_v14 = vmul.f32 %v2284_v61, %v1264_v54 }
 0x12a   : > { %v866_v29 = vadd.f32 %v1898_v51, %v2190_v41  ;;  %v857_v37 = vpop.f32.mrb[33].mxu0  ;;  %1229 = vst.msk [vmem:[#allocation2 + $0x220] sm:$0xff] %vm1160_vm3, %v1156_v53  ;;  %v1364_v51 = vmul.f32 %v2294_v10, %v1352_v60 }
 0x12b   : > { %v858_v49 = vadd.f32 %v2190_v41, %v857_v37  ;;  %v1899_v50 = vpop.f32.mrb[34].mxu0  ;;  %v1287_v52 = vadd.f32 %v1279_v26, %v2327_v46  ;;  %v1353_v26 = vld [vmem:[#allocation2 + $0x1e0] sm:$0xff]  ;;  %v1395_v37 = vmul.f32 %v2280_v58, %v1383_v0  ;;  %v1284_v5 = vadd.f32 %v1276_v14, %v2302_v19 }
 0x12c   : > { %v1050_v55 = vmax.f32 %v866_v29, 0.0  ;;  %v860_v59 = vpop.f32.mrb[35].mxu0  ;;  %v1280_v29 = vmul.f32 %v2421_v7, %v2284_v61  ;;  %v1372_v42 = vadd.f32 %v1364_v51, %v1343_v25  ;;  %v2464_v25 = vld [vmem:[#allocation2 + $0x70] sm:$0xff] }
 0x12d   : > { %v1048_v3 = vmax.f32 %v858_v49, 0.0  ;;  %v1315_v46 = vadd.f32 %v2347_v6, %v1287_v52  ;;  %v2447_v49 = vmul.f32 %v2257_v30, %v1412_v15  ;;  %v1365_v52 = vmul.f32 %v2294_v10, %v1353_v26  ;;  %v1355_v59 = vld [vmem:[#allocation2 + $0x200] sm:$0xff] }
 0x12e   : > { %v1122_v12 = vmin.f32 %v1050_v55, 6.0  ;;  %v1288_v55 = vadd.f32 %v1280_v29, %v2387_v56  ;;  %v1367_v19 = vmul.f32 %v2294_v10, %v1355_v59  ;;  %v1254_v59 = vmul.f32 %v2247_v16, %v2464_v25 }
 0x12f   : > { %v1120_v18 = vmin.f32 %v1048_v3, 6.0  ;;  %v1344_v54 = vadd.f32 %v2324_v44, %v1315_v46  ;;  %v1366_v46 = vmul.f32 %v2294_v10, %v1354_v39  ;;  %v1441_v14 = vld [vmem:[#allocation2 + $0xf0] sm:$0xff] }
 0x130   : > { %1195 = vst.msk [vmem:[#allocation2 + $0x110] sm:$0xff] %vm1160_vm3, %v1122_v12  ;;  %v2434_v34 = vld [vmem:[#allocation2 + $0xe0] sm:$0xff]  ;;  %v1316_v44 = vadd.f32 %v2398_v43, %v1288_v55  ;;  %v1277_v43 = vmul.f32 %v2284_v61, %v2457_v9 }
 0x131   : > { %1193 = vst.msk [vmem:[#allocation2 + $0x100] sm:$0xff] %vm1160_vm3, %v1120_v18  ;;  %v1902_v6 = vpop.f32.mrb[36].mxu0  ;;  %v1281_v38 = vmul.f32 %v2284_v61, %v2434_v34  ;;  %v2469_v55 = vld [vmem:[#allocation2 + $0x61] sm:$0xff] }
 0x132   : > { %v882_v50 = vadd.f32 %v1902_v6, %v2190_v41  ;;  %v873_v53 = vpop.f32.mrb[37].mxu0 }
 0x133   : > { %v874_v60 = vadd.f32 %v2190_v41, %v873_v53  ;;  %v1903_v3 = vpop.f32.mrb[38].mxu0  ;;  %v1289_v0 = vadd.f32 %v1281_v38, %v2392_v62  ;;  %v1373_v38 = vadd.f32 %v1365_v52, %v1344_v54  ;;  %v2478_v54 = vld [vmem:[#allocation2 + $0x71] sm:$0xff] }
 0x134   : > { %v1054_v12 = vmax.f32 %v882_v50, 0.0  ;;  %v885_v18 = vadd.f32 %v1903_v3, %v2190_v41  ;;  %v876_v6 = vpop.f32.mrb[39].mxu0  ;;  %v1345_v50 = vadd.f32 %v2410_v23, %v1316_v44  ;;  %v1282_v23 = vmul.f32 %v1441_v14, %v2284_v61 }
 0x135   : > { %v1052_v56 = vmax.f32 %v874_v60, 0.0  ;;  %v877_v26 = vadd.f32 %v2190_v41, %v876_v6  ;;  %v1317_v29 = vadd.f32 %v2404_v20, %v1289_v0  ;;  %v1253_v20 = vmul.f32 %v1412_v15, %v2247_v16  ;;  %v1327_v6 = vld [vmem:[#allocation2 + $0x180] sm:$0xff] }
 0x136   : > { %v1126_v62 = vmin.f32 %v1054_v12, 6.0  ;;  %v1055_v51 = vmax.f32 %v885_v18, 0.0  ;;  %v1374_v0 = vadd.f32 %v1366_v46, %v1345_v50  ;;  %v1400_v16 = vadd.f32 %v2351_v11, %v1372_v42 }
 0x137   : > { %v1124_v53 = vmin.f32 %v1052_v56, 6.0  ;;  %v1053_v3 = vmax.f32 %v877_v26, 0.0  ;;  %v1346_v39 = vadd.f32 %v1338_v2, %v1317_v29  ;;  %v1351_v2 = vld [vmem:[#allocation2 + $0x1c0] sm:$0xff]  ;;  %v1401_v15 = vadd.f32 %v2355_v17, %v1373_v38  ;;  %v1328_v26 = vld [vmem:[#allocation2 + $0x190] sm:$0xff] }
 0x138   : > { %1199 = vst.msk [vmem:[#allocation2 + $0x130] sm:$0xff] %vm1160_vm3, %v1126_v62  ;;  %v1127_v41 = vmin.f32 %v1055_v51, 6.0  ;;  %v2475_v60 = vld [vmem:[#allocation2 + $0x100] sm:$0xff]  ;;  %v1290_v44 = vadd.f32 %v1282_v23, %v1253_v20  ;;  %v1310_v56 = vmul.f32 %v2469_v55, %v2262_v35  ;;  %v1356_v29 = vld [vmem:[#allocation2 + $0x210] sm:$0xff]  ;;  %v1285_v46 = vadd.f32 %v1277_v43, %v2298_v13 }
 0x139   : > { %1197 = vst.msk [vmem:[#allocation2 + $0x120] sm:$0xff] %vm1160_vm3, %v1124_v53  ;;  %v1125_v52 = vmin.f32 %v1053_v3, 6.0  ;;  %v1375_v12 = vadd.f32 %v1367_v19, %v1346_v39  ;;  %v1283_v18 = vmul.f32 %v2284_v61, %v2475_v60  ;;  %v1311_v61 = vmul.f32 %v2262_v35, %v2478_v54  ;;  %v1357_v51 = vld [vmem:[#allocation2 + $0x220] sm:$0xff] }
 0x13a   : > { %1200 = vst.msk [vmem:[#allocation2 + $0x138] sm:$0xff] %vm1160_vm3, %v1127_v41  ;;  %v1312_v11 = vadd.f32 %v2312_v27, %v1284_v5  ;;  %v1363_v17 = vmul.f32 %v2294_v10, %v1351_v2  ;;  %v1318_v42 = vadd.f32 %v1310_v56, %v1290_v44  ;;  %v1339_v38 = vmul.f32 %v2268_v45, %v1327_v6  ;;  %v1385_v27 = vld [vmem:[#allocation2 + $0x191] sm:$0xff]  ;;  %v1384_v23 = vld [vmem:[#allocation2 + $0x181] sm:$0xff] }
 0x13b   : > { %1198 = vst.msk [vmem:[#allocation2 + $0x128] sm:$0xff] %vm1160_vm3, %v1125_v52  ;;  %v1403_v19 = vadd.f32 %v1395_v37, %v1375_v12  ;;  %v1291_v62 = vadd.f32 %v1283_v18, %v1254_v59  ;;  %v1402_v50 = vadd.f32 %v2424_v8, %v1374_v0  ;;  %v1340_v3 = vmul.f32 %v2268_v45, %v1328_v26 }
 0x13c   : > { %v1368_v13 = vmul.f32 %v2294_v10, %v1356_v29  ;;  %v1429_v37 = vadd.f32 %v2359_v21, %v1400_v16  ;;  %v1430_v43 = vadd.f32 %v2370_v32, %v1401_v15  ;;  %v1347_v35 = vadd.f32 %v1339_v38, %v1318_v42 }
 0x13d   : > { %v1319_v53 = vadd.f32 %v1311_v61, %v1291_v62  ;;  %v1369_v39 = vmul.f32 %v2294_v10, %v1357_v51  ;;  %v1313_v5 = vadd.f32 %v2307_v22, %v1285_v46  ;;  %v1450_v20 = vmul.f32 %v2288_v4, %v2406_v1 }
 0x13e   : > { %v1432_v8 = vadd.f32 %v2447_v49, %v1403_v19  ;;  %v1451_v21 = vmul.f32 %v2288_v4, %v2421_v7  ;;  %v1453_v32 = vmul.f32 %v2288_v4, %v1441_v14  ;;  %v1376_v10 = vadd.f32 %v1368_v13, %v1347_v35  ;;  %v1414_v49 = vld [vmem:[#allocation2 + $0x80] sm:$0xff] }
 0x13f   : > { %v1322_v41 = vld [vmem:[#allocation2 + $0x130] sm:$0xff]  ;;  %v1348_v59 = vadd.f32 %v1340_v3, %v1319_v53  ;;  %v1431_v12 = vadd.f32 %v2444_v48, %v1402_v50  ;;  %v1397_v1 = vmul.f32 %v2280_v58, %v1385_v27  ;;  %v1458_v15 = vadd.f32 %v1450_v20, %v1429_v37  ;;  %v1471_v35 = vld [vmem:[#allocation2 + $0x81] sm:$0xff] }
 0x140   : > { %v1321_v52 = vld [vmem:[#allocation2 + $0x120] sm:$0xff]  ;;  %v1334_v2 = vmul.f32 %v2268_v45, %v1322_v41  ;;  %v1459_v44 = vadd.f32 %v1451_v21, %v1430_v43  ;;  %v1396_v56 = vmul.f32 %v2280_v58, %v1384_v23  ;;  %v1452_v7 = vmul.f32 %v2288_v4, %v2434_v34 }
 0x141   : > { %v1333_v0 = vmul.f32 %v2268_v45, %v1321_v52  ;;  %v1379_v22 = vld [vmem:[#allocation2 + $0x131] sm:$0xff]  ;;  %v1377_v18 = vadd.f32 %v1369_v39, %v1348_v59  ;;  %v1461_v14 = vadd.f32 %v1453_v32, %v1432_v8  ;;  %v1426_v19 = vmul.f32 %v2257_v30, %v1414_v49 }
 0x142   : > { %v1342_v6 = vadd.f32 %v1334_v2, %v1313_v5  ;;  %v1378_v16 = vld [vmem:[#allocation2 + $0x121] sm:$0xff]  ;;  %v1391_v46 = vmul.f32 %v2280_v58, %v1379_v22  ;;  %v1404_v48 = vadd.f32 %v1396_v56, %v1376_v10  ;;  %v1460_v51 = vadd.f32 %v1452_v7, %v1431_v12 }
 0x143   : > { %v1341_v26 = vadd.f32 %v1333_v0, %v1312_v11  ;;  %v1405_v29 = vadd.f32 %v1397_v1, %v1377_v18  ;;  %v1390_v61 = vmul.f32 %v2280_v58, %v1378_v16  ;;  %v1481_v42 = vmul.f32 %v2367_v31, %v2469_v55  ;;  %v1443_v11 = vld [vmem:[#allocation2 + $0x110] sm:$0xff] }
 0x144   : > { %v1371_v45 = vadd.f32 %v1363_v17, %v1342_v6  ;;  %v1487_v34 = vadd.f32 %v2378_v40, %v1459_v44  ;;  %v1425_v17 = vmul.f32 %v2257_v30, %v2464_v25  ;;  %v1449_v3 = vmul.f32 %v2288_v4, %v2361_v24  ;;  %v1808_v24 = vld [vmem:[%s2578_s4] ss:$0 sm:$0xff] }
 0x145   : > { %v1370_v62 = vadd.f32 %v2432_v28, %v1341_v26  ;;  %v1434_v50 = vadd.f32 %v1426_v19, %v1405_v29  ;;  %v1480_v28 = vmul.f32 %v2367_v31, %v2394_v63  ;;  %v1489_v58 = vadd.f32 %v1481_v42, %v1461_v14 }
 0x146   : > { %v1399_v38 = vadd.f32 %v1391_v46, %v1371_v45  ;;  %v1486_v55 = vadd.f32 %v2374_v36, %v1458_v15  ;;  %v1433_v37 = vadd.f32 %v1425_v17, %v1404_v48  ;;  %v1455_v43 = vmul.f32 %v2288_v4, %v1443_v11 }
 0x147   : > { %v1398_v53 = vadd.f32 %v1390_v61, %v1370_v62  ;;  %v1448_v30 = vmul.f32 %v2288_v4, %v2457_v9  ;;  %v1477_v25 = vmul.f32 %v2367_v31, %v2329_v47  ;;  %v1488_v63 = vadd.f32 %v1480_v28, %v1460_v51  ;;  %v1809_v62 = vld [vmem:[%s2580_s6] ss:$0 sm:$0xff] }
 0x148   : > { %v1428_v13 = vadd.f32 %v2338_v57, %v1399_v38  ;;  %v1502_v39 = vadd.f32 %v1808_v24, %v1487_v34  ;;  %v1454_v36 = vmul.f32 %v2288_v4, %v2475_v60  ;;  %v1463_v27 = vadd.f32 %v1455_v43, %v1434_v50 }
 0x149   : > { %v1427_v40 = vadd.f32 %v2316_v33, %v1398_v53  ;;  %v2584_v33 = vld [vmem:[#allocation3_spill] sm:$0xff]  ;;  %v1504_v9 = vadd.f32 %v1808_v24, %v1489_v58  ;;  %v1501_v8 = vadd.f32 %v1808_v24, %v1486_v55  ;;  %v1483_v59 = vmul.f32 %v2367_v31, %v1471_v35 }
 0x14a   : > { %v1457_v57 = vadd.f32 %v1449_v3, %v1428_v13  ;;  %v1476_v41 = vmul.f32 %v2367_v31, %v2584_v33  ;;  %v1462_v47 = vadd.f32 %v1454_v36, %v1433_v37  ;;  %v1503_v52 = vadd.f32 %v1808_v24, %v1488_v63 }
 0x14b   : > { %v1456_v5 = vadd.f32 %v1448_v30, %v1427_v40  ;;  %v1510_v21 = vmax.f32 %v1502_v39, 0.0  ;;  %v1482_v32 = vmul.f32 %v2367_v31, %v2478_v54  ;;  %v1491_v10 = vadd.f32 %v1483_v59, %v1463_v27 }
 0x14c   : > { %v1485_v20 = vadd.f32 %v1477_v25, %v1457_v57  ;;  %v1512_v60 = vmax.f32 %v1504_v9, 0.0  ;;  %v1509_v22 = vmax.f32 %v1501_v8, 0.0  ;;  %v1511_v1 = vmax.f32 %v1503_v52, 0.0 }
 0x14d   : > { %v1484_v23 = vadd.f32 %v1476_v41, %v1456_v5  ;;  %v1490_v12 = vadd.f32 %v1482_v32, %v1462_v47  ;;  %v1518_v6 = vmin.f32 %v1510_v21, 6.0  ;;  %v1506_v16 = vadd.f32 %v1808_v24, %v1491_v10 }
 0x14e   : > { %v1500_v2 = vadd.f32 %v1808_v24, %v1485_v20  ;;  %v1520_v44 = vmin.f32 %v1512_v60, 6.0  ;;  %v1517_v56 = vmin.f32 %v1509_v22, 6.0  ;;  %v1519_v14 = vmin.f32 %v1511_v1, 6.0 }
 0x14f   : > { %v1499_v4 = vadd.f32 %v1808_v24, %v1484_v23  ;;  %v1505_v26 = vadd.f32 %v1808_v24, %v1490_v12  ;;  %v1514_v31 = vmax.f32 %v1506_v16, 0.0 }
 0x150   : > { %v1508_v0 = vmax.f32 %v1500_v2, 0.0  ;;  %v1524_v29 = vpack.c.bf16 %v1518_v6, %v1517_v56  ;;  %v1525_v54 = vpack.c.bf16 %v1520_v44, %v1519_v14 }
 0x151   : > { %v1507_v18 = vmax.f32 %v1499_v4, 0.0  ;;  %v1513_v45 = vmax.f32 %v1505_v26, 0.0  ;;  %v1522_v46 = vmin.f32 %v1514_v31, 6.0 }
 0x152   : > { %v1516_v49 = vmin.f32 %v1508_v0, 6.0 }
 0x153   : > { %v1515_v15 = vmin.f32 %v1507_v18, 6.0  ;;  %v1521_v48 = vmin.f32 %v1513_v45, 6.0 }
 0x155   : > { %v1523_v7 = vpack.c.bf16 %v1516_v49, %v1515_v15  ;;  %v1526_v19 = vpack.c.bf16 %v1522_v46, %v1521_v48 }
 0x157   : > { %1940 = vmatprep.mubr.msk.bf16.mxu1 %vm1160_vm3, %v1523_v7 }
 0x158   : > { %1941 = vmatmul.mubr.msk.bf16.vlgmr.msra.gmra.mrb[32].mxu1 %vm1160_vm3, %v1524_v29 }
 0x159   : > { %1944 = vmatprep.mubr.msk.bf16.mxu1 %vm1160_vm3, %v1525_v54 }
 0x160   : > { %1945 = vmatmul.mubr.msk.bf16.gmra.mrb[36].mxu1 %vm1160_vm3, %v1526_v19 }
 0x22b   : > { %v1942_v61 = vpop.f32.mrb[32].mxu1 }
 0x22c   : > { %v1605_v51 = vadd.f32 %v1942_v61, %v1809_v62  ;;  %v1596_v42 = vpop.f32.mrb[33].mxu1 }
 0x22d   : > { %v1597_v11 = vadd.f32 %v1809_v62, %v1596_v42  ;;  %v1943_v38 = vpop.f32.mrb[34].mxu1 }
 0x22e   : > { %1630 = vst.msk [vmem:[%s319_s9 + $0x10] sm:$0xff] %vm1627_vm4, %v1605_v51  ;;  %v1608_v34 = vadd.f32 %v1943_v38, %v1809_v62  ;;  %v1599_v17 = vpop.f32.mrb[35].mxu1 }
 0x22f   : > { %1628 = vst.msk [vmem:[%s319_s9] sm:$0xff] %vm1627_vm4, %v1597_v11  ;;  %v1600_v50 = vadd.f32 %v1809_v62, %v1599_v17 }
 0x230   : > { %1631 = vst.msk [vmem:[%s319_s9 + $0x18] sm:$0xff] %vm1627_vm4, %v1608_v34 }
 0x231   : > { %1629 = vst.msk [vmem:[%s319_s9 + $0x8] sm:$0xff] %vm1627_vm4, %v1600_v50 }
 0x233   : > { %v1946_v53 = vpop.f32.mrb[36].mxu1 }
 0x234   : > { %v1621_v3 = vadd.f32 %v1946_v53, %v1809_v62  ;;  %v1612_v28 = vpop.f32.mrb[37].mxu1 }
 0x235   : > { %v1613_v58 = vadd.f32 %v1809_v62, %v1612_v28  ;;  %v1947_v13 = vpop.f32.mrb[38].mxu1 }
 0x236   : > { %1634 = vst.msk [vmem:[%s319_s9 + $0x30] sm:$0xff] %vm1627_vm4, %v1621_v3  ;;  %v1624_v55 = vadd.f32 %v1947_v13, %v1809_v62  ;;  %v1615_v37 = vpop.f32.mrb[39].mxu1 }
 0x237   : > { %1632 = vst.msk [vmem:[%s319_s9 + $0x20] sm:$0xff] %vm1627_vm4, %v1613_v58  ;;  %v1616_v43 = vadd.f32 %v1809_v62, %v1615_v37 }
 0x238   : > { %1635 = vst.msk [vmem:[%s319_s9 + $0x38] sm:$0xff] %vm1627_vm4, %v1624_v55 }
 0x239   : > { %1633 = vst.msk [vmem:[%s319_s9 + $0x28] sm:$0xff] %vm1627_vm4, %v1616_v43 }
 0x23a PF: > { %s17_s26 = sadd.s32 1, %s2038_s26   ;;  %s2585_s24 = smov %s2034_s25 }
 0x23b   : > { %p14_p5 = scmp.ge.s32.totalorder %s17_s26, 4   ;;  %s2586_s25 = smov %s2588_s27 }
 0x23d   :  { %16 = sbr.rel (!%p14_p5) target bundleno = 2 (0x2), region = 83 }

</bundles_post_ra>
